<compile_context>
chip_gen: v5e
topology: v5e:2x2
jax: 0.10.0
libtpu: 0.0.40
codegen_flags: <defaults>
</compile_context>

<pallas_src>
import jax
import jax.numpy as jnp
from jax.experimental import pallas as pl
from jax.experimental.pallas import tpu as pltpu


def value_head_kernel(x_ref, w_ref, b_ref, o_ref):
    # x_ref: [TB, H] streamed batch tile (input dtype; bf16 stays bf16 in HBM/VMEM)
    # w_ref: [1, H]  f32 weight row, constant block index -> resident across grid
    # b_ref: [1]     f32 bias scalar in SMEM
    # o_ref: [TB, 1] f32 output tile
    x = x_ref[...].astype(jnp.float32)   # per-vreg upcast: free (HBM-bound), and
                                         # v5e's VPU has no bf16 ALUs anyway
    w = w_ref[...]                       # full-precision f32 weight
    # VPU elementwise multiply + XLU cross-lane reduction, f32 accumulation.
    v = jnp.sum(x * w, axis=-1, keepdims=True)          # [TB, 1]
    o_ref[...] = (v + b_ref[0]).astype(o_ref.dtype)


def _round_down_8(n):
    return max(8, (n // 8) * 8)


def _round_up_8(n):
    return ((n + 7) // 8) * 8


def _vmem_budget_bytes():
    """Generation-aware scoped-VMEM budget.

    ~75% of physical per-TC VMEM, capped at 100 MiB:
      v5e/v6e (128 MiB physical) -> 96 MiB,  v7x (64 MiB physical) -> 48 MiB.
    Falls back to the most restrictive generation (v7x) if the query fails.
    """
    phys = 64 * 1024 * 1024
    try:
        info = pltpu.get_tpu_info()
        phys = int(getattr(info, "vmem_capacity_bytes", phys)) or phys
    except Exception:
        pass
    return min((phys * 3) // 4, 100 * 1024 * 1024)


def base_value_forward(x, w, b):
    """Value estimate from state representation.

    x: [B, H]            activations (f32 or bf16)
    w: [H, 1] float32    value-head weight
    b: [1, 1] float32    value-head bias
    returns: [B, 1] float32
    """
    B, H = x.shape
    w_row = w.reshape(1, H).astype(jnp.float32)   # lane-dense, resident, f32
    b_s = b.reshape(1).astype(jnp.float32)        # scalar bias -> SMEM

    vmem_budget = _vmem_budget_bytes()
    itemsize = jnp.dtype(x.dtype).itemsize

    # Per-row VMEM cost: 2x double-buffered input tile + one f32 temp, in case
    # the upcast/product materializes instead of fusing per-vreg.
    bytes_per_row = (2 * itemsize + 4) * H
    slack = 2 * 1024 * 1024                       # weight/output bufs + scratch
    tb_cap = _round_down_8((vmem_budget - slack) // bytes_per_row)

    # Aim for multi-MiB x tiles per grid step (per-step overhead ~0.35 us;
    # streaming roofline wants >= ~2-4 MiB/step), bounded by the VMEM cap.
    target_rows = _round_down_8(max(8, (4 * 1024 * 1024) // (H * itemsize)))
    tb = min(tb_cap, target_rows)

    if B > 256:
        # Force >= 2 grid steps so the "parallel" batch axis can shard across
        # the 2 TensorCores of a v7x megacore.
        tb = min(tb, _round_up_8(pl.cdiv(B, 2)))
    if tb >= B:
        tb = B                                    # single full-batch block

    grid = (pl.cdiv(B, tb),)

    return pl.pallas_call(
        value_head_kernel,
        out_shape=jax.ShapeDtypeStruct((B, 1), jnp.float32),
        grid_spec=pltpu.PrefetchScalarGridSpec(
            num_scalar_prefetch=0,
            grid=grid,
            in_specs=[
                pl.BlockSpec((tb, H), lambda i: (i, 0)),            # streamed x tile
                pl.BlockSpec((1, H), lambda i: (0, 0)),             # resident f32 weight
                pl.BlockSpec(memory_space=pltpu.MemorySpace.SMEM),  # bias scalar
            ],
            out_specs=pl.BlockSpec((tb, 1), lambda i: (i, 0)),
        ),
        compiler_params=pltpu.CompilerParams(
            dimension_semantics=("parallel",),     # megacore-splittable batch
            vmem_limit_bytes=int(vmem_budget),
        ),
    )(x, w_row, b_s)


if __name__ == "__main__":
    key = jax.random.PRNGKey(0)
    kx, kw, kb = jax.random.split(key, 3)

    B, H = 8, 32  # small shapes: batch=8, hidden=32

    x = jax.random.normal(kx, (B, H), dtype=jnp.float32)
    # Deterministic parameter init (synthetic; no checkpoint load).
    w = jax.random.normal(kw, (H, 1), dtype=jnp.float32) * (1.0 / jnp.sqrt(H))
    b = jax.random.normal(kb, (1, 1), dtype=jnp.float32) * 0.01

    out = jax.block_until_ready(base_value_forward(x, w, b))
    ref = x @ w + b
    assert out.shape == (B, 1)
    assert jnp.allclose(out, ref, atol=1e-5, rtol=1e-5)

    # Multi-step (tiled, ragged last block, megacore-splittable) path.
    B2 = 260
    x2 = jax.random.normal(kx, (B2, H), dtype=jnp.float32)
    out2 = jax.block_until_ready(base_value_forward(x2, w, b))
    ref2 = x2 @ w + b
    assert out2.shape == (B2, 1)
    assert jnp.allclose(out2, ref2, atol=1e-5, rtol=1e-5)

    # bf16 activations: product now formed in f32 against the f32 weight row.
    xb = x.astype(jnp.bfloat16)
    outb = jax.block_until_ready(base_value_forward(xb, w, b))
    refb = xb.astype(jnp.float32) @ w + b
    assert jnp.allclose(outb, refb, atol=1e-4, rtol=1e-4)

    print("KERNEL_OK")
</pallas_src>

<mosaic_0001>
module attributes {stable_mosaic.version = 11 : i64} {
  func.func @value_head_kernel(%arg0: i32, %arg1: memref<8x32xf32, #tpu.memory_space<vmem>>, %arg2: memref<1x32xf32, #tpu.memory_space<vmem>>, %arg3: memref<1xf32, #tpu.memory_space<smem>>, %arg4: memref<8x1xf32, #tpu.memory_space<vmem>>) attributes {dimension_semantics = [#tpu.dimension_semantics<parallel>], iteration_bounds = array<i64: 1>, scalar_prefetch = 0 : i64, scratch_operands = 0 : i64, tpu.core_type = #tpu.core_type<tc>, window_params = [{transform_indices = @transform_0, window_bounds = array<i64: 8, 32>}, {pipeline_mode = #tpu.pipeline_mode<synchronous>, transform_indices = @transform_1, window_bounds = array<i64: 1, 32>}, {transform_indices = @transform_2, window_bounds = array<i64: 1>}, {transform_indices = @transform_3, window_bounds = array<i64: 8, 1>}]} {
    %c0 = arith.constant 0 : index
    %c0_0 = arith.constant 0 : index
    %0 = vector.load %arg1[%c0, %c0_0] : memref<8x32xf32, #tpu.memory_space<vmem>>, vector<8x32xf32>
    %c0_1 = arith.constant 0 : index
    %c0_2 = arith.constant 0 : index
    %1 = vector.load %arg2[%c0_1, %c0_2] : memref<1x32xf32, #tpu.memory_space<vmem>>, vector<1x32xf32>
    %2 = vector.broadcast %1 : vector<1x32xf32> to vector<8x32xf32>
    %3 = arith.mulf %0, %2 : vector<8x32xf32>
    %cst = arith.constant dense<0.000000e+00> : vector<8xf32>
    %4 = vector.multi_reduction <add>, %3, %cst [1] : vector<8x32xf32> to vector<8xf32>
    %5 = vector.shape_cast %4 : vector<8xf32> to vector<8x1xf32>
    %c0_3 = arith.constant 0 : index
    %6 = memref.load %arg3[%c0_3] : memref<1xf32, #tpu.memory_space<smem>>
    %7 = vector.broadcast %6 : f32 to vector<8x1xf32>
    %8 = arith.addf %5, %7 : vector<8x1xf32>
    %c0_4 = arith.constant 0 : index
    %c0_5 = arith.constant 0 : index
    %9 = vector.load %arg4[%c0_4, %c0_5] : memref<8x1xf32, #tpu.memory_space<vmem>>, vector<8x1xf32>
    tpu.vector_store %arg4[%c0_4, %c0_5], %8 {strides = array<i32>} : memref<8x1xf32, #tpu.memory_space<vmem>>, vector<8x1xf32>,
    return
  }
  func.func @transform_0(%arg0: i32) -> (i32, i32) {
    %c0_i32 = arith.constant 0 : i32
    %c0_i32_0 = arith.constant 0 : i32
    return %arg0, %c0_i32 : i32, i32
  }
  func.func @transform_1(%arg0: i32) -> (i32, i32) {
    %c0_i32 = arith.constant 0 : i32
    %c0_i32_0 = arith.constant 0 : i32
    %c0_i32_1 = arith.constant 0 : i32
    return %c0_i32, %c0_i32_0 : i32, i32
  }
  func.func @transform_2(%arg0: i32) -> i32 {
    %c0_i32 = arith.constant 0 : i32
    %c0_i32_0 = arith.constant 0 : i32
    return %c0_i32 : i32
  }
  func.func @transform_3(%arg0: i32) -> (i32, i32) {
    %c0_i32 = arith.constant 0 : i32
    %c0_i32_0 = arith.constant 0 : i32
    return %arg0, %c0_i32 : i32, i32
  }
}

</mosaic_0001>

<bundles_post_ra>
// kernel: tpu_custom_call.1
= control target key start
LH: loop header
LB: loop body
LE: loop exit
PB: predicated region body
PF: predicated region fallthrough
CT: control target
= control target key end

     0   :  { %9 = vsyncpa [#allocation4], 0  ;;  %s77_s15 = smov [#allocation3]   ;;  %s110_s0 = inlined_call_operand.hbm [shape: f32[8,32], index: 0, kind: input, shape index: {}]   ;;  %s111_s1 = inlined_call_operand.vmem [shape: f32[1,32], index: 1, kind: input, shape index: {}]   ;;  %s112_s2 = inlined_call_operand.<no memory space> [shape: f32[1], index: 2, kind: input, shape index: {}]   ;;  %s113_s3 = inlined_call_operand.vmem [shape: f32[8,1], index: 3, kind: output, shape index: {}]  }
   0x1   :  { %s15_s14 = sshll.u32 %s110_s0, 4  ;;  %s17_s16 = sshll.u32 %s77_s15, 4  ;;  %s16_s14 = int_to_ptr.hbm [resolvable:$true] %s15_s14  ;;  %s18_s16 = int_to_ptr.vmem [resolvable:$true] %s17_s16 }
   0x2   :  { %20 = dma.hbm_to_vmem [thread:$0]  %s16_s14, 128, %s18_s16, [#allocation4]  }
   0x3   :  { %75 = dma.done.wait [#allocation4], 128  }
   0x4   :  { %76 = vsyncadd [#allocation4], 4294967168  ;;  %v29_v0 = vld [vmem:[#allocation3] sm:$0xff]  ;;  %vm35_vm0 = vcmask 261120   ;;  %v40_v4 = vstv %s112_s2  ;;  %vm42_vm1 = vcmask 7168  }
   0x5   :  { %v50_v1 = vld [vmem:[%s111_s1] ss:$0 sm:$0xff] }
   0x6   :  { %v34_v2 = vmul.f32 %v50_v1, %v29_v0 }
   0x8   :  { %v36_v3 = vsel %vm35_vm0, %v34_v2, 0.0 }
   0x9   :  { %37 = vadd.xlane.f32.xlu0 %v36_v3 }
  0x7c   :  { %v38_v5 = vpop.xlane.xlu0 %37 }
  0x7d   :  { %v41_v6 = vadd.f32 %v40_v4, %v38_v5 }
  0x7f   :  { %43 = vst.msk [vmem:[%s113_s3] sm:$0xff] %vm42_vm1, %v41_v6 }
  0x80   :  { %48 = vsyncpa [#allocation4], 1 }

</bundles_post_ra>
